<compile_context>
chip_gen: v6e
topology: v6e:2x2x1
jax: 0.10.0
libtpu: 0.0.40
codegen_flags: <defaults>
</compile_context>

<pallas_src>
import functools

import jax
import jax.numpy as jnp
from jax.experimental import pallas as pl
from jax.experimental.pallas import tpu as pltpu

_LANE = 128
_SUBLANE = 8


def _round_up(n, m):
    return ((n + m - 1) // m) * m


# ----------------------------- fused Pallas kernel ---------------------------
def _mlp_kernel(*refs, activations):
    """refs = (x_ref, w1_ref, b1_ref, w2_ref, b2_ref, ..., out_ref).

    Chains act(h @ w + b) for every layer entirely inside VMEM for one batch
    tile; only the final (lane-dense, padded) activation is stored.
    """
    x_ref = refs[0]
    out_ref = refs[-1]
    param_refs = refs[1:-1]

    h = x_ref[...]
    for i, act in enumerate(activations):
        w = param_refs[2 * i][...]
        b = param_refs[2 * i + 1][...]          # (1, d_out_padded), broadcasts
        h = jnp.dot(h, w, preferred_element_type=jnp.float32) + b
        if act == "tanh":
            h = jnp.tanh(h)                     # EUP
        elif act == "sigmoid":
            # exp(-x) on the EUP + full-precision reciprocal: avoids a VALU
            # divide while staying within the 1e-5 reference tolerance.
            h = pl.reciprocal(1.0 + jnp.exp(-h), approx=False)
        elif act == "none":
            pass
        else:
            raise ValueError(f"unknown activation {act}")
    out_ref[...] = h.astype(out_ref.dtype)


def _build_fused_forward(batch, d_in, layers, tile_batch=128):
    """Build a jitted fused forward for a chain of (w, b, activation) layers.

    All feature dims (including the input dim) are zero-padded to 128-lane
    multiples ONCE at build time.  The batch dim is tiled with `tile_batch`
    rows per grid step; weights/biases stay resident in VMEM across tiles.
    Returns (forward_fn, padded_params); forward_fn(x, *padded_params)
    returns the un-padded (batch, d_out) result.
    """
    activations = tuple(act for (_, _, act) in layers)

    d_in_p = _round_up(d_in, _LANE)

    padded_params = []
    cur_in = d_in_p
    for (w, b, _) in layers:
        di, do = w.shape
        do_p = _round_up(do, _LANE)
        # Rows beyond the previous layer's true width are zero -> no effect.
        w_p = jnp.zeros((cur_in, do_p), w.dtype).at[:di, :do].set(w)
        b_p = jnp.zeros((1, do_p), b.dtype).at[0, :do].set(b.reshape(-1))
        padded_params += [w_p, b_p]
        cur_in = do_p

    d_out = layers[-1][0].shape[1]
    d_out_p = cur_in

    # Batch tiling: TB rows per grid step (sublane-aligned), batch padded to a
    # multiple of TB so every tile is full and every store is unmasked.
    tb = min(tile_batch, _round_up(batch, _SUBLANE))
    batch_p = _round_up(batch, tb)
    grid = (batch_p // tb,)

    in_specs = [pl.BlockSpec((tb, d_in_p), lambda i: (i, 0))]
    for p in padded_params:
        # Constant index_map -> block index never changes -> no re-DMA per tile.
        in_specs.append(pl.BlockSpec(p.shape, lambda i: (0, 0)))
    out_spec = pl.BlockSpec((tb, d_out_p), lambda i: (i, 0))

    kernel = functools.partial(_mlp_kernel, activations=activations)

    fused_call = pl.pallas_call(
        kernel,
        out_shape=jax.ShapeDtypeStruct((batch_p, d_out_p), jnp.float32),
        grid=grid,
        in_specs=in_specs,
        out_specs=out_spec,
        compiler_params=pltpu.CompilerParams(
            # Batch tiles are independent -> shard across v7x's 2 TensorCores.
            dimension_semantics=("parallel",),
        ),
    )

    @jax.jit
    def forward(x, *params):
        # Pad x to a lane-dense (batch_p, 128) slab once per call (inside the
        # same jit/dispatch as the kernel).
        x_p = jnp.zeros((batch_p, d_in_p), jnp.float32).at[:batch, :d_in].set(x)
        y = fused_call(x_p, *params)
        # Padded output columns hold sigmoid(0)=0.5 (not zero) -> must be
        # sliced off before returning to consumers.  Still one dispatch.
        return y[:batch, :d_out]

    return forward, tuple(padded_params)


# --------------------------- Sequentiel container ----------------------------
class LinearActLayer:
    """One Linear+activation layer; parameters held raw, padded at fuse time."""

    def __init__(self, w, b, activation):
        self.w = w
        self.b = b
        self.activation = activation


class Sequentiel:
    """Mirror of the PyTorch Sequentiel: forward(data) chains layer forwards.

    The chain is lowered to a single fused Pallas kernel (built lazily and
    cached per input shape); intermediate activations never leave VMEM.
    """

    def __init__(self):
        self._modules = []
        self._outputs = []
        self._fused = None      # (x_shape, forward_fn, padded_params)

    def add_module(self, layer):
        self._modules.append(layer)
        self._fused = None      # invalidate fused program

    def forward(self, data):
        batch, d_in = data.shape
        if self._fused is None or self._fused[0] != data.shape:
            layers = [(m.w, m.b, m.activation) for m in self._modules]
            fwd, params = _build_fused_forward(batch, d_in, layers)
            self._fused = (data.shape, fwd, params)
        _, fwd, params = self._fused

        output = fwd(data, *params)
        # Only the final output is recorded: intermediates stay in VMEM.
        self._outputs = [output]
        return output

    # TODO(synk): zero_grad / backward / update_parameters are training-time
    # bookkeeping of the reference framework, not part of the forward kernel.


# ----------------------------------- main ------------------------------------
if __name__ == "__main__":
    key = jax.random.PRNGKey(0)
    k_x, k_w1, k_b1, k_w2, k_b2 = jax.random.split(key, 5)

    # batch=256 -> two 128-row tiles on the parallel grid axis.
    batch, d_in, d_hidden, d_out = 256, 32, 64, 16

    x = jax.random.normal(k_x, (batch, d_in), dtype=jnp.float32)
    w1 = 0.1 * jax.random.normal(k_w1, (d_in, d_hidden), dtype=jnp.float32)
    b1 = 0.1 * jax.random.normal(k_b1, (d_hidden,), dtype=jnp.float32)
    w2 = 0.1 * jax.random.normal(k_w2, (d_hidden, d_out), dtype=jnp.float32)
    b2 = 0.1 * jax.random.normal(k_b2, (d_out,), dtype=jnp.float32)

    net = Sequentiel()
    net.add_module(LinearActLayer(w1, b1, "tanh"))
    net.add_module(LinearActLayer(w2, b2, "sigmoid"))

    out = net.forward(x)
    out = jax.block_until_ready(out)

    # pure-JAX reference check of the chained forward
    ref = jax.nn.sigmoid(jnp.tanh(x @ w1 + b1) @ w2 + b2)
    assert out.shape == (batch, d_out)
    assert jnp.allclose(out, ref, atol=1e-5, rtol=1e-5)

    print("KERNEL_OK")
</pallas_src>

<mosaic_0001>
module attributes {stable_mosaic.version = 11 : i64} {
  func.func @_mlp_kernel(%arg0: i32, %arg1: memref<128x128xf32, #tpu.memory_space<vmem>>, %arg2: memref<128x128xf32, #tpu.memory_space<vmem>>, %arg3: memref<1x128xf32, #tpu.memory_space<vmem>>, %arg4: memref<128x128xf32, #tpu.memory_space<vmem>>, %arg5: memref<1x128xf32, #tpu.memory_space<vmem>>, %arg6: memref<128x128xf32, #tpu.memory_space<vmem>>) attributes {dimension_semantics = [#tpu.dimension_semantics<parallel>], iteration_bounds = array<i64: 2>, scalar_prefetch = 0 : i64, scratch_operands = 0 : i64, tpu.core_type = #tpu.core_type<tc>, window_params = [{transform_indices = @transform_0, window_bounds = array<i64: 128, 128>}, {pipeline_mode = #tpu.pipeline_mode<synchronous>, transform_indices = @transform_1, window_bounds = array<i64: 128, 128>}, {pipeline_mode = #tpu.pipeline_mode<synchronous>, transform_indices = @transform_2, window_bounds = array<i64: 1, 128>}, {pipeline_mode = #tpu.pipeline_mode<synchronous>, transform_indices = @transform_3, window_bounds = array<i64: 128, 128>}, {pipeline_mode = #tpu.pipeline_mode<synchronous>, transform_indices = @transform_4, window_bounds = array<i64: 1, 128>}, {transform_indices = @transform_5, window_bounds = array<i64: 128, 128>}]} {
    %c0 = arith.constant 0 : index
    %c0_0 = arith.constant 0 : index
    %0 = vector.load %arg1[%c0, %c0_0] : memref<128x128xf32, #tpu.memory_space<vmem>>, vector<128x128xf32>
    %c0_1 = arith.constant 0 : index
    %c0_2 = arith.constant 0 : index
    %1 = vector.load %arg2[%c0_1, %c0_2] : memref<128x128xf32, #tpu.memory_space<vmem>>, vector<128x128xf32>
    %c0_3 = arith.constant 0 : index
    %c0_4 = arith.constant 0 : index
    %2 = vector.load %arg3[%c0_3, %c0_4] : memref<1x128xf32, #tpu.memory_space<vmem>>, vector<1x128xf32>
    %cst = arith.constant dense<0.000000e+00> : vector<128x128xf32>
    %3 = tpu.matmul %0, %1, %cst {dimension_numbers = #tpu.dot_dimension_numbers<[1], [0], [0], [1], [0, 0, 1, 1], [], []>} : vector<128x128xf32>, vector<128x128xf32>, vector<128x128xf32> -> vector<128x128xf32>
    %4 = vector.broadcast %2 : vector<1x128xf32> to vector<128x128xf32>
    %5 = arith.addf %3, %4 : vector<128x128xf32>
    %6 = math.tanh %5 : vector<128x128xf32>
    %c0_5 = arith.constant 0 : index
    %c0_6 = arith.constant 0 : index
    %7 = vector.load %arg4[%c0_5, %c0_6] : memref<128x128xf32, #tpu.memory_space<vmem>>, vector<128x128xf32>
    %c0_7 = arith.constant 0 : index
    %c0_8 = arith.constant 0 : index
    %8 = vector.load %arg5[%c0_7, %c0_8] : memref<1x128xf32, #tpu.memory_space<vmem>>, vector<1x128xf32>
    %cst_9 = arith.constant dense<0.000000e+00> : vector<128x128xf32>
    %9 = tpu.matmul %6, %7, %cst_9 {dimension_numbers = #tpu.dot_dimension_numbers<[1], [0], [0], [1], [0, 0, 1, 1], [], []>} : vector<128x128xf32>, vector<128x128xf32>, vector<128x128xf32> -> vector<128x128xf32>
    %10 = vector.broadcast %8 : vector<1x128xf32> to vector<128x128xf32>
    %11 = arith.addf %9, %10 : vector<128x128xf32>
    %cst_10 = arith.constant 0.000000e+00 : f32
    %12 = vector.broadcast %cst_10 : f32 to vector<128x128xf32>
    %13 = arith.subf %12, %11 : vector<128x128xf32>
    %14 = math.exp %13 : vector<128x128xf32>
    %cst_11 = arith.constant 1.000000e+00 : f32
    %15 = vector.broadcast %cst_11 : f32 to vector<128x128xf32>
    %16 = arith.addf %15, %14 : vector<128x128xf32>
    %17 = tpu.reciprocal %16 : vector<128x128xf32> -> vector<128x128xf32>
    %c0_12 = arith.constant 0 : index
    %c0_13 = arith.constant 0 : index
    %18 = vector.load %arg6[%c0_12, %c0_13] : memref<128x128xf32, #tpu.memory_space<vmem>>, vector<128x128xf32>
    tpu.vector_store %arg6[%c0_12, %c0_13], %17 {strides = array<i32>} : memref<128x128xf32, #tpu.memory_space<vmem>>, vector<128x128xf32>,
    return
  }
  func.func @transform_0(%arg0: i32) -> (i32, i32) {
    %c0_i32 = arith.constant 0 : i32
    %c0_i32_0 = arith.constant 0 : i32
    return %arg0, %c0_i32 : i32, i32
  }
  func.func @transform_1(%arg0: i32) -> (i32, i32) {
    %c0_i32 = arith.constant 0 : i32
    %c0_i32_0 = arith.constant 0 : i32
    %c0_i32_1 = arith.constant 0 : i32
    return %c0_i32, %c0_i32_0 : i32, i32
  }
  func.func @transform_2(%arg0: i32) -> (i32, i32) {
    %c0_i32 = arith.constant 0 : i32
    %c0_i32_0 = arith.constant 0 : i32
    %c0_i32_1 = arith.constant 0 : i32
    return %c0_i32, %c0_i32_0 : i32, i32
  }
  func.func @transform_3(%arg0: i32) -> (i32, i32) {
    %c0_i32 = arith.constant 0 : i32
    %c0_i32_0 = arith.constant 0 : i32
    %c0_i32_1 = arith.constant 0 : i32
    return %c0_i32, %c0_i32_0 : i32, i32
  }
  func.func @transform_4(%arg0: i32) -> (i32, i32) {
    %c0_i32 = arith.constant 0 : i32
    %c0_i32_0 = arith.constant 0 : i32
    %c0_i32_1 = arith.constant 0 : i32
    return %c0_i32, %c0_i32_0 : i32, i32
  }
  func.func @transform_5(%arg0: i32) -> (i32, i32) {
    %c0_i32 = arith.constant 0 : i32
    %c0_i32_0 = arith.constant 0 : i32
    return %arg0, %c0_i32 : i32, i32
  }
}

</mosaic_0001>

<bundles_post_ra>
// kernel: forward.1
= control target key start
LH: loop header
LB: loop body
LE: loop exit
PB: predicated region body
PF: predicated region fallthrough
CT: control target
= control target key end

     0   :  { %s1079_s18 = smov 0   ;;  %s1259_s0 = inlined_call_operand.vmem [shape: f32[256,128], index: 0, kind: input, shape index: {}]   ;;  %s1260_s1 = inlined_call_operand.vmem [shape: f32[128,128], index: 1, kind: input, shape index: {}]   ;;  %s1261_s2 = inlined_call_operand.vmem [shape: f32[1,128], index: 2, kind: input, shape index: {}]   ;;  %s1262_s3 = inlined_call_operand.vmem [shape: f32[128,128], index: 3, kind: input, shape index: {}]   ;;  %s1263_s4 = inlined_call_operand.vmem [shape: f32[1,128], index: 4, kind: input, shape index: {}]   ;;  %s1264_s5 = inlined_call_operand.vmem [shape: f32[256,128], index: 5, kind: output, shape index: {}]  }
   0x1 LB: > { %s748_s19 = sadd.s32 4294967295, %s1047_s18   ;;  %p752_p0 = scmp.ge.s32.totalorder %s1047_s18, 1  ;;  %s1047_s18 = sphi %s1079_s18, %s15_s18  }
   0x2   : > { %p188_p1 = scmp.lt.s32.totalorder %s1047_s18, 3 }
   0x4   : > { %p189_p2 = pnand %p752_p0, %p188_p1 }
   0x5   : > { %s753_s24 = sshll.u32 (!%p189_p2), %s748_s19, 4 }
   0x6   : > { %192 = sbr.rel (%p189_p2) target bundleno = 517 (0x205), region = 40  ;;  %p217_p3 = scmp.lt.s32.totalorder (!%p189_p2), %s753_s24, 31 }
   0xb   : > { %v259_v0 = vld [vmem:[%s1260_s1 + $0x78] sm:$0xff]  ;;  %v258_v1 = vld [vmem:[%s1260_s1 + $0x70] sm:$0xff]  ;;  %v257_v2 = vld [vmem:[%s1260_s1 + $0x68] sm:$0xff]  ;;  %s1266_s24 = smov (!%p217_p3, %s753_s24), 31 }
   0xc   : > { %825 = vmatprep.subr.mxu0 %v259_v0  ;;  %v256_v3 = vld [vmem:[%s1260_s1 + $0x60] sm:$0xff]  ;;  %s754_s29 = sshll.u32 %s1266_s24, 3  ;;  %v443_v4 = vld [vmem:[%s1262_s3 + $0x78] sm:$0xff]  ;;  %v442_v6 = vld [vmem:[%s1262_s3 + $0x70] sm:$0xff] }
   0xd   : > { %826 = vmatpush3.msra.mxu0 %v259_v0  ;;  %v255_v5 = vld [vmem:[%s1260_s1 + $0x58] sm:$0xff]  ;;  %s1113_s11 = scalar_lea.vmem %s1259_s0, %s754_s29  ;;  %881 = vmatprep.subr.mxu1 %v443_v4  ;;  %v254_v8 = vld [vmem:[%s1260_s1 + $0x50] sm:$0xff]  ;;  %v441_v9 = vld [vmem:[%s1262_s3 + $0x68] sm:$0xff]  ;;  %s1238_s30 = scalar_lea.vmem %s1264_s5, %s754_s29 }
   0xe   : > { %827 = vmatprep.subr.mxu0 %v258_v1  ;;  %v228_v7 = vld [vmem:[%s1113_s11] sm:$0xff]  ;;  %882 = vmatpush3.msra.mxu1 %v443_v4  ;;  %v253_v10 = vld [vmem:[%s1260_s1 + $0x48] sm:$0xff]  ;;  %v439_v13 = vld [vmem:[%s1262_s3 + $0x58] sm:$0xff] }
   0xf   : > { %828 = vmatpush3.msra.mxu0 %v258_v1  ;;  %857 = vmatprep.mubr.f32.mxu0 %v228_v7  ;;  %v440_v11 = vld [vmem:[%s1262_s3 + $0x60] sm:$0xff]  ;;  %v251_v14 = vld [vmem:[%s1260_s1 + $0x38] sm:$0xff]  ;;  %v438_v15 = vld [vmem:[%s1262_s3 + $0x50] sm:$0xff] }
  0x10   : > { %829 = vmatprep.subr.mxu0 %v257_v2  ;;  %883 = vmatprep.subr.mxu1 %v442_v6  ;;  %v252_v12 = vld [vmem:[%s1260_s1 + $0x40] sm:$0xff]  ;;  %v250_v16 = vld [vmem:[%s1260_s1 + $0x30] sm:$0xff]  ;;  %v249_v17 = vld [vmem:[%s1260_s1 + $0x28] sm:$0xff] }
  0x11   : > { %830 = vmatpush3.msra.mxu0 %v257_v2  ;;  %884 = vmatpush3.msra.mxu1 %v442_v6  ;;  %v248_v18 = vld [vmem:[%s1260_s1 + $0x20] sm:$0xff]  ;;  %v247_v19 = vld [vmem:[%s1260_s1 + $0x18] sm:$0xff]  ;;  %v246_v20 = vld [vmem:[%s1260_s1 + $0x10] sm:$0xff] }
  0x12   : > { %831 = vmatprep.subr.mxu0 %v256_v3  ;;  %885 = vmatprep.subr.mxu1 %v441_v9  ;;  %v245_v21 = vld [vmem:[%s1260_s1 + $0x8] sm:$0xff]  ;;  %v244_v22 = vld [vmem:[%s1260_s1] sm:$0xff]  ;;  %v230_v24 = vld [vmem:[%s1113_s11 + $0x10] sm:$0xff] }
  0x13   : > { %832 = vmatpush3.msra.mxu0 %v256_v3  ;;  %886 = vmatpush3.msra.mxu1 %v441_v9  ;;  %v229_v23 = vld [vmem:[%s1113_s11 + $0x8] sm:$0xff]  ;;  %v231_v25 = vld [vmem:[%s1113_s11 + $0x18] sm:$0xff]  ;;  %v232_v26 = vld [vmem:[%s1113_s11 + $0x20] sm:$0xff] }
  0x14   : > { %833 = vmatprep.subr.mxu0 %v255_v5  ;;  %887 = vmatprep.subr.mxu1 %v440_v11  ;;  %v233_v27 = vld [vmem:[%s1113_s11 + $0x28] sm:$0xff]  ;;  %v234_v28 = vld [vmem:[%s1113_s11 + $0x30] sm:$0xff]  ;;  %v235_v29 = vld [vmem:[%s1113_s11 + $0x38] sm:$0xff] }
  0x15   : > { %834 = vmatpush3.msra.mxu0 %v255_v5  ;;  %888 = vmatpush3.msra.mxu1 %v440_v11  ;;  %v236_v30 = vld [vmem:[%s1113_s11 + $0x40] sm:$0xff]  ;;  %v237_v31 = vld [vmem:[%s1113_s11 + $0x48] sm:$0xff]  ;;  %v238_v32 = vld [vmem:[%s1113_s11 + $0x50] sm:$0xff] }
  0x16   : > { %835 = vmatprep.subr.mxu0 %v254_v8  ;;  %889 = vmatprep.subr.mxu1 %v439_v13  ;;  %v239_v33 = vld [vmem:[%s1113_s11 + $0x58] sm:$0xff]  ;;  %v240_v34 = vld [vmem:[%s1113_s11 + $0x60] sm:$0xff]  ;;  %v241_v35 = vld [vmem:[%s1113_s11 + $0x68] sm:$0xff] }
  0x17   : > { %836 = vmatpush3.msra.mxu0 %v254_v8  ;;  %890 = vmatpush3.msra.mxu1 %v439_v13  ;;  %v242_v36 = vld [vmem:[%s1113_s11 + $0x70] sm:$0xff]  ;;  %v243_v37 = vld [vmem:[%s1113_s11 + $0x78] sm:$0xff]  ;;  %v437_v38 = vld [vmem:[%s1262_s3 + $0x48] sm:$0xff] }
  0x18   : > { %837 = vmatprep.subr.mxu0 %v253_v10  ;;  %891 = vmatprep.subr.mxu1 %v438_v15  ;;  %v436_v39 = vld [vmem:[%s1262_s3 + $0x40] sm:$0xff]  ;;  %v435_v40 = vld [vmem:[%s1262_s3 + $0x38] sm:$0xff]  ;;  %v434_v41 = vld [vmem:[%s1262_s3 + $0x30] sm:$0xff] }
  0x19   : > { %838 = vmatpush3.msra.mxu0 %v253_v10  ;;  %892 = vmatpush3.msra.mxu1 %v438_v15  ;;  %v433_v42 = vld [vmem:[%s1262_s3 + $0x28] sm:$0xff]  ;;  %v432_v43 = vld [vmem:[%s1262_s3 + $0x20] sm:$0xff]  ;;  %v431_v44 = vld [vmem:[%s1262_s3 + $0x18] sm:$0xff] }
  0x1a   : > { %839 = vmatprep.subr.mxu0 %v252_v12  ;;  %893 = vmatprep.subr.mxu1 %v437_v38  ;;  %v430_v45 = vld [vmem:[%s1262_s3 + $0x10] sm:$0xff]  ;;  %v429_v46 = vld [vmem:[%s1262_s3 + $0x8] sm:$0xff]  ;;  %v428_v47 = vld [vmem:[%s1262_s3] sm:$0xff] }
  0x1b   : > { %840 = vmatpush3.msra.mxu0 %v252_v12  ;;  %894 = vmatpush3.msra.mxu1 %v437_v38  ;;  %v757_v48 = vld [vmem:[%s1261_s2] ss:$0 sm:$0xff] }
  0x1c   : > { %841 = vmatprep.subr.mxu0 %v251_v14  ;;  %895 = vmatprep.subr.mxu1 %v436_v39 }
  0x1d   : > { %842 = vmatpush3.msra.mxu0 %v251_v14  ;;  %896 = vmatpush3.msra.mxu1 %v436_v39 }
  0x1e   : > { %843 = vmatprep.subr.mxu0 %v250_v16  ;;  %897 = vmatprep.subr.mxu1 %v435_v40 }
  0x1f   : > { %844 = vmatpush3.msra.mxu0 %v250_v16  ;;  %898 = vmatpush3.msra.mxu1 %v435_v40 }
  0x20   : > { %845 = vmatprep.subr.mxu0 %v249_v17  ;;  %899 = vmatprep.subr.mxu1 %v434_v41 }
  0x21   : > { %846 = vmatpush3.msra.mxu0 %v249_v17  ;;  %900 = vmatpush3.msra.mxu1 %v434_v41 }
  0x22   : > { %847 = vmatprep.subr.mxu0 %v248_v18  ;;  %901 = vmatprep.subr.mxu1 %v433_v42 }
  0x23   : > { %848 = vmatpush3.msra.mxu0 %v248_v18  ;;  %902 = vmatpush3.msra.mxu1 %v433_v42 }
  0x24   : > { %849 = vmatprep.subr.mxu0 %v247_v19  ;;  %903 = vmatprep.subr.mxu1 %v432_v43 }
  0x25   : > { %850 = vmatpush3.msra.mxu0 %v247_v19  ;;  %904 = vmatpush3.msra.mxu1 %v432_v43 }
  0x26   : > { %851 = vmatprep.subr.mxu0 %v246_v20  ;;  %905 = vmatprep.subr.mxu1 %v431_v44 }
  0x27   : > { %852 = vmatpush3.msra.mxu0 %v246_v20  ;;  %906 = vmatpush3.msra.mxu1 %v431_v44 }
  0x28   : > { %853 = vmatprep.subr.mxu0 %v245_v21  ;;  %907 = vmatprep.subr.mxu1 %v430_v45 }
  0x29   : > { %854 = vmatpush3.msra.mxu0 %v245_v21  ;;  %908 = vmatpush3.msra.mxu1 %v430_v45 }
  0x2a   : > { %855 = vmatprep.subr.mxu0 %v244_v22  ;;  %909 = vmatprep.subr.mxu1 %v429_v46 }
  0x2b   : > { %856 = vmatpush3.msra.mxu0 %v244_v22  ;;  %910 = vmatpush3.msra.mxu1 %v429_v46 }
  0x2c   : > { %858 = vmatmul.mubr.f32.vlgmr.msra.gmra.mxu0 %v229_v23  ;;  %911 = vmatprep.subr.mxu1 %v428_v47 }
  0x2d   : > { %860 = vmatprep.mubr.f32.mxu0 %v230_v24  ;;  %912 = vmatpush3.msra.mxu1 %v428_v47 }
  0x30   : > { %861 = vmatmul.mubr.f32.gmra.mxu0 %v231_v25 }
  0x31   : > { %863 = vmatprep.mubr.f32.mxu0 %v232_v26 }
  0x34   : > { %864 = vmatmul.mubr.f32.gmra.mxu0 %v233_v27 }
  0x35   : > { %866 = vmatprep.mubr.f32.mxu0 %v234_v28 }
  0x38   : > { %867 = vmatmul.mubr.f32.gmra.mxu0 %v235_v29 }
  0x39   : > { %869 = vmatprep.mubr.f32.mxu0 %v236_v30 }
  0x3c   : > { %870 = vmatmul.mubr.f32.gmra.mxu0 %v237_v31 }
  0x3d   : > { %872 = vmatprep.mubr.f32.mxu0 %v238_v32 }
  0x40   : > { %873 = vmatmul.mubr.f32.gmra.mxu0 %v239_v33  ;;  %v1215_v33 = vld [vmem:[%s1263_s4] ss:$0 sm:$0xff] }
  0x41   : > { %875 = vmatprep.mubr.f32.mxu0 %v240_v34 }
  0x44   : > { %876 = vmatmul.mubr.f32.gmra.mxu0 %v241_v35 }
  0x45   : > { %878 = vmatprep.mubr.f32.mxu0 %v242_v36 }
  0x48   : > { %879 = vmatmul.mubr.f32.gmra.mxu0 %v243_v37 }
  0xec   : > { %v859_v49 = vpop.f32.mrf.mxu0 }
  0xed   : > { %v339_v50 = vadd.f32 %v859_v49, %v757_v48 }
  0xee   : > { %v333_v51 = vpop.f32.mrf.mxu0 }
  0xef   : > { %v334_v52 = vadd.f32 %v757_v48, %v333_v51 }
  0xf0   : > { %v862_v53 = vpop.f32.mrf.mxu0 }
  0xf1   : > { %945 = vtanh.f32 %v334_v52  ;;  %v349_v54 = vadd.f32 %v862_v53, %v757_v48 }
  0xf2   : > { %947 = vtanh.f32 %v339_v50  ;;  %v343_v55 = vpop.f32.mrf.mxu0 }
  0xf3   : > { %v344_v56 = vadd.f32 %v757_v48, %v343_v55 }
  0xf4   : > { %v865_v57 = vpop.f32.mrf.mxu0 }
  0xf5   : > { %949 = vtanh.f32 %v344_v56  ;;  %v359_v58 = vadd.f32 %v865_v57, %v757_v48 }
  0xf6   : > { %951 = vtanh.f32 %v349_v54  ;;  %v353_v59 = vpop.f32.mrf.mxu0 }
  0xf7   : > { %v354_v60 = vadd.f32 %v757_v48, %v353_v59 }
  0xf8   : > { %v868_v61 = vpop.f32.mrf.mxu0 }
  0xf9   : > { %953 = vtanh.f32 %v354_v60  ;;  %v369_v62 = vadd.f32 %v868_v61, %v757_v48 }
  0xfa   : > { %955 = vtanh.f32 %v359_v58  ;;  %v363_v63 = vpop.f32.mrf.mxu0 }
  0xfb   : > { %v364_v0 = vadd.f32 %v757_v48, %v363_v63 }
  0xfc   : > { %v871_v1 = vpop.f32.mrf.mxu0 }
  0xfd   : > { %957 = vtanh.f32 %v364_v0  ;;  %v379_v3 = vadd.f32 %v871_v1, %v757_v48 }
  0xfe   : > { %v946_v2 = vpop.eup %945  ;;  %959 = vtanh.f32 %v369_v62  ;;  %v373_v4 = vpop.f32.mrf.mxu0 }
  0xff   : > { %v948_v5 = vpop.eup %947  ;;  %v374_v6 = vadd.f32 %v757_v48, %v373_v4  ;;  %913 = vmatprep.mubr.f32.mxu1 %v946_v2 }
 0x100   : > { %v874_v7 = vpop.f32.mrf.mxu0  ;;  %914 = vmatmul.mubr.f32.vlgmr.msra.gmra.mxu1 %v948_v5 }
 0x101   : > { %961 = vtanh.f32 %v374_v6  ;;  %v389_v9 = vadd.f32 %v874_v7, %v757_v48 }
 0x102   : > { %v950_v8 = vpop.eup %949  ;;  %963 = vtanh.f32 %v379_v3  ;;  %v383_v10 = vpop.f32.mrf.mxu0 }
 0x103   : > { %v952_v11 = vpop.eup %951  ;;  %v384_v12 = vadd.f32 %v757_v48, %v383_v10  ;;  %916 = vmatprep.mubr.f32.mxu1 %v950_v8 }
 0x104   : > { %v877_v13 = vpop.f32.mrf.mxu0  ;;  %917 = vmatmul.mubr.f32.gmra.mxu1 %v952_v11 }
 0x105   : > { %965 = vtanh.f32 %v384_v12  ;;  %v399_v15 = vadd.f32 %v877_v13, %v757_v48 }
 0x106   : > { %v954_v14 = vpop.eup %953  ;;  %967 = vtanh.f32 %v389_v9  ;;  %v393_v16 = vpop.f32.mrf.mxu0 }
 0x107   : > { %v956_v17 = vpop.eup %955  ;;  %v394_v18 = vadd.f32 %v757_v48, %v393_v16  ;;  %919 = vmatprep.mubr.f32.mxu1 %v954_v14 }
 0x108   : > { %v880_v19 = vpop.f32.mrf.mxu0  ;;  %920 = vmatmul.mubr.f32.gmra.mxu1 %v956_v17 }
 0x109   : > { %969 = vtanh.f32 %v394_v18  ;;  %v409_v21 = vadd.f32 %v880_v19, %v757_v48 }
 0x10a   : > { %v958_v20 = vpop.eup %957  ;;  %971 = vtanh.f32 %v399_v15  ;;  %v403_v22 = vpop.f32.mrf.mxu0 }
 0x10b   : > { %v960_v23 = vpop.eup %959  ;;  %v404_v24 = vadd.f32 %v757_v48, %v403_v22  ;;  %922 = vmatprep.mubr.f32.mxu1 %v958_v20 }
 0x10c   : > { %923 = vmatmul.mubr.f32.gmra.mxu1 %v960_v23 }
 0x10d   : > { %973 = vtanh.f32 %v404_v24 }
 0x10e   : > { %v962_v25 = vpop.eup %961  ;;  %975 = vtanh.f32 %v409_v21 }
 0x10f   : > { %v964_v26 = vpop.eup %963  ;;  %925 = vmatprep.mubr.f32.mxu1 %v962_v25 }
 0x110   : > { %926 = vmatmul.mubr.f32.gmra.mxu1 %v964_v26 }
 0x112   : > { %v966_v27 = vpop.eup %965 }
 0x113   : > { %v968_v28 = vpop.eup %967  ;;  %928 = vmatprep.mubr.f32.mxu1 %v966_v27 }
 0x114   : > { %929 = vmatmul.mubr.f32.gmra.mxu1 %v968_v28 }
 0x116   : > { %v970_v29 = vpop.eup %969 }
 0x117   : > { %v972_v30 = vpop.eup %971  ;;  %931 = vmatprep.mubr.f32.mxu1 %v970_v29 }
 0x118   : > { %932 = vmatmul.mubr.f32.gmra.mxu1 %v972_v30 }
 0x11a   : > { %v974_v31 = vpop.eup %973 }
 0x11b   : > { %v976_v32 = vpop.eup %975  ;;  %934 = vmatprep.mubr.f32.mxu1 %v974_v31 }
 0x11c   : > { %935 = vmatmul.mubr.f32.gmra.mxu1 %v976_v32 }
 0x1c0   : > { %v915_v34 = vpop.f32.mrf.mxu1 }
 0x1c1   : > { %v523_v35 = vadd.f32 %v915_v34, %v1215_v33 }
 0x1c2   : > { %v517_v36 = vpop.f32.mrf.mxu1 }
 0x1c3   : > { %v597_v37 = vsub.f32 0.0, %v523_v35  ;;  %v518_v38 = vadd.f32 %v1215_v33, %v517_v36 }
 0x1c4   : > { %v918_v39 = vpop.f32.mrf.mxu1 }
 0x1c5   : > { %v614_v40 = vmul.f32 1.442695, %v597_v37  ;;  %v596_v41 = vsub.f32 0.0, %v518_v38  ;;  %v533_v42 = vadd.f32 %v918_v39, %v1215_v33 }
 0x1c6   : > { %v527_v43 = vpop.f32.mrf.mxu1 }
 0x1c7   : > { %977 = vpow2.f32 %v614_v40  ;;  %v612_v44 = vmul.f32 1.442695, %v596_v41  ;;  %v599_v45 = vsub.f32 0.0, %v533_v42  ;;  %v528_v46 = vadd.f32 %v1215_v33, %v527_v43 }
 0x1c8   : > { %v921_v47 = vpop.f32.mrf.mxu1 }
 0x1c9   : > { %979 = vpow2.f32 %v612_v44  ;;  %v618_v48 = vmul.f32 1.442695, %v599_v45  ;;  %v598_v49 = vsub.f32 0.0, %v528_v46  ;;  %v543_v50 = vadd.f32 %v921_v47, %v1215_v33 }
 0x1ca   : > { %v537_v51 = vpop.f32.mrf.mxu1 }
 0x1cb   : > { %981 = vpow2.f32 %v618_v48  ;;  %v616_v52 = vmul.f32 1.442695, %v598_v49  ;;  %v601_v53 = vsub.f32 0.0, %v543_v50  ;;  %v538_v54 = vadd.f32 %v1215_v33, %v537_v51 }
 0x1cc   : > { %v924_v55 = vpop.f32.mrf.mxu1 }
 0x1cd   : > { %983 = vpow2.f32 %v616_v52  ;;  %v622_v56 = vmul.f32 1.442695, %v601_v53  ;;  %v600_v57 = vsub.f32 0.0, %v538_v54  ;;  %v553_v58 = vadd.f32 %v924_v55, %v1215_v33 }
 0x1ce   : > { %v547_v59 = vpop.f32.mrf.mxu1 }
 0x1cf   : > { %985 = vpow2.f32 %v622_v56  ;;  %v620_v60 = vmul.f32 1.442695, %v600_v57  ;;  %v603_v61 = vsub.f32 0.0, %v553_v58  ;;  %v548_v62 = vadd.f32 %v1215_v33, %v547_v59 }
 0x1d0   : > { %v927_v63 = vpop.f32.mrf.mxu1 }
 0x1d1   : > { %987 = vpow2.f32 %v620_v60  ;;  %v626_v0 = vmul.f32 1.442695, %v603_v61  ;;  %v602_v1 = vsub.f32 0.0, %v548_v62  ;;  %v563_v2 = vadd.f32 %v927_v63, %v1215_v33 }
 0x1d2   : > { %v557_v3 = vpop.f32.mrf.mxu1 }
 0x1d3   : > { %989 = vpow2.f32 %v626_v0  ;;  %v624_v4 = vmul.f32 1.442695, %v602_v1  ;;  %v605_v5 = vsub.f32 0.0, %v563_v2  ;;  %v558_v6 = vadd.f32 %v1215_v33, %v557_v3 }
 0x1d4   : > { %v978_v7 = vpop.eup %977  ;;  %v930_v8 = vpop.f32.mrf.mxu1 }
 0x1d5   : > { %v645_v9 = vadd.f32 1.0, %v978_v7  ;;  %991 = vpow2.f32 %v624_v4  ;;  %v630_v10 = vmul.f32 1.442695, %v605_v5  ;;  %v604_v11 = vsub.f32 0.0, %v558_v6 }
 0x1d6   : > { %v980_v12 = vpop.eup %979  ;;  %v573_v13 = vadd.f32 %v930_v8, %v1215_v33  ;;  %v567_v14 = vpop.f32.mrf.mxu1 }
 0x1d7   : > { %993 = vrcp.f32 %v645_v9  ;;  %v644_v15 = vadd.f32 1.0, %v980_v12  ;;  %v628_v16 = vmul.f32 1.442695, %v604_v11  ;;  %v568_v17 = vadd.f32 %v1215_v33, %v567_v14 }
 0x1d8   : > { %v982_v18 = vpop.eup %981  ;;  %995 = vpow2.f32 %v630_v10  ;;  %v607_v19 = vsub.f32 0.0, %v573_v13  ;;  %v933_v20 = vpop.f32.mrf.mxu1 }
 0x1d9   : > { %997 = vrcp.f32 %v644_v15  ;;  %v647_v21 = vadd.f32 1.0, %v982_v18  ;;  %v606_v22 = vsub.f32 0.0, %v568_v17  ;;  %v583_v23 = vadd.f32 %v933_v20, %v1215_v33 }
 0x1da   : > { %v984_v24 = vpop.eup %983  ;;  %999 = vpow2.f32 %v628_v16  ;;  %v634_v25 = vmul.f32 1.442695, %v607_v19  ;;  %v577_v26 = vpop.f32.mrf.mxu1 }
 0x1db   : > { %1001 = vrcp.f32 %v647_v21  ;;  %v646_v27 = vadd.f32 1.0, %v984_v24  ;;  %v632_v28 = vmul.f32 1.442695, %v606_v22  ;;  %v609_v29 = vsub.f32 0.0, %v583_v23 }
 0x1dc   : > { %v986_v30 = vpop.eup %985  ;;  %1003 = vpow2.f32 %v634_v25  ;;  %v578_v31 = vadd.f32 %v1215_v33, %v577_v26  ;;  %v936_v32 = vpop.f32.mrf.mxu1 }
 0x1dd   : > { %1005 = vrcp.f32 %v646_v27  ;;  %v649_v34 = vadd.f32 1.0, %v986_v30  ;;  %v638_v35 = vmul.f32 1.442695, %v609_v29  ;;  %v593_v36 = vadd.f32 %v936_v32, %v1215_v33 }
 0x1de   : > { %v988_v37 = vpop.eup %987  ;;  %1007 = vpow2.f32 %v632_v28  ;;  %v608_v38 = vsub.f32 0.0, %v578_v31  ;;  %v587_v39 = vpop.f32.mrf.mxu1 }
 0x1df   : > { %1009 = vrcp.f32 %v649_v34  ;;  %v648_v40 = vadd.f32 1.0, %v988_v37  ;;  %v611_v41 = vsub.f32 0.0, %v593_v36  ;;  %v588_v42 = vadd.f32 %v1215_v33, %v587_v39 }
 0x1e0   : > { %v990_v43 = vpop.eup %989  ;;  %1011 = vpow2.f32 %v638_v35  ;;  %v636_v44 = vmul.f32 1.442695, %v608_v38 }
 0x1e1   : > { %1013 = vrcp.f32 %v648_v40  ;;  %v651_v45 = vadd.f32 1.0, %v990_v43  ;;  %v642_v46 = vmul.f32 1.442695, %v611_v41  ;;  %v610_v47 = vsub.f32 0.0, %v588_v42 }
 0x1e2   : > { %v992_v48 = vpop.eup %991  ;;  %1015 = vpow2.f32 %v636_v44 }
 0x1e3   : > { %1017 = vrcp.f32 %v651_v45  ;;  %v650_v49 = vadd.f32 1.0, %v992_v48  ;;  %v640_v33 = vmul.f32 1.442695, %v610_v47 }
 0x1e4   : > { %v994_v50 = vpop.eup %993  ;;  %1019 = vpow2.f32 %v642_v46 }
 0x1e5   : > { %v996_v51 = vpop.eup %995  ;;  %677 = vst [vmem:[%s1238_s30 + $0x8] sm:$0xff] %v994_v50  ;;  %1021 = vrcp.f32 %v650_v49 }
 0x1e6   : > { %v998_v52 = vpop.eup %997  ;;  %v653_v53 = vadd.f32 1.0, %v996_v51  ;;  %1023 = vpow2.f32 %v640_v33 }
 0x1e7   : > { %v1000_v54 = vpop.eup %999  ;;  %676 = vst [vmem:[%s1238_s30] sm:$0xff] %v998_v52 }
 0x1e8   : > { %v1002_v55 = vpop.eup %1001  ;;  %1025 = vrcp.f32 %v653_v53  ;;  %v652_v56 = vadd.f32 1.0, %v1000_v54 }
 0x1e9   : > { %v1004_v57 = vpop.eup %1003  ;;  %679 = vst [vmem:[%s1238_s30 + $0x18] sm:$0xff] %v1002_v55 }
 0x1ea   : > { %v1006_v58 = vpop.eup %1005  ;;  %1027 = vrcp.f32 %v652_v56  ;;  %v655_v59 = vadd.f32 1.0, %v1004_v57 }
 0x1eb   : > { %v1008_v60 = vpop.eup %1007  ;;  %678 = vst [vmem:[%s1238_s30 + $0x10] sm:$0xff] %v1006_v58 }
 0x1ec   : > { %v1010_v61 = vpop.eup %1009  ;;  %1029 = vrcp.f32 %v655_v59  ;;  %v654_v62 = vadd.f32 1.0, %v1008_v60 }
 0x1ed   : > { %v1012_v63 = vpop.eup %1011  ;;  %681 = vst [vmem:[%s1238_s30 + $0x28] sm:$0xff] %v1010_v61 }
 0x1ee   : > { %v1014_v0 = vpop.eup %1013  ;;  %1031 = vrcp.f32 %v654_v62  ;;  %v657_v1 = vadd.f32 1.0, %v1012_v63 }
 0x1ef   : > { %v1016_v2 = vpop.eup %1015  ;;  %680 = vst [vmem:[%s1238_s30 + $0x20] sm:$0xff] %v1014_v0 }
 0x1f0   : > { %v1018_v3 = vpop.eup %1017  ;;  %1033 = vrcp.f32 %v657_v1  ;;  %v656_v4 = vadd.f32 1.0, %v1016_v2 }
 0x1f1   : > { %v1020_v5 = vpop.eup %1019  ;;  %683 = vst [vmem:[%s1238_s30 + $0x38] sm:$0xff] %v1018_v3 }
 0x1f2   : > { %v1022_v6 = vpop.eup %1021  ;;  %1035 = vrcp.f32 %v656_v4  ;;  %v659_v7 = vadd.f32 1.0, %v1020_v5 }
 0x1f3   : > { %v1024_v8 = vpop.eup %1023  ;;  %682 = vst [vmem:[%s1238_s30 + $0x30] sm:$0xff] %v1022_v6 }
 0x1f4   : > { %1037 = vrcp.f32 %v659_v7  ;;  %v658_v9 = vadd.f32 1.0, %v1024_v8 }
 0x1f5   : > { %v1026_v10 = vpop.eup %1025 }
 0x1f6   : > { %685 = vst [vmem:[%s1238_s30 + $0x48] sm:$0xff] %v1026_v10  ;;  %1039 = vrcp.f32 %v658_v9 }
 0x1f7   : > { %v1028_v11 = vpop.eup %1027 }
 0x1f8   : > { %684 = vst [vmem:[%s1238_s30 + $0x40] sm:$0xff] %v1028_v11 }
 0x1f9   : > { %v1030_v12 = vpop.eup %1029 }
 0x1fa   : > { %687 = vst [vmem:[%s1238_s30 + $0x58] sm:$0xff] %v1030_v12 }
 0x1fb   : > { %v1032_v13 = vpop.eup %1031 }
 0x1fc   : > { %686 = vst [vmem:[%s1238_s30 + $0x50] sm:$0xff] %v1032_v13 }
 0x1fd   : > { %v1034_v14 = vpop.eup %1033 }
 0x1fe   : > { %689 = vst [vmem:[%s1238_s30 + $0x68] sm:$0xff] %v1034_v14 }
 0x1ff   : > { %v1036_v15 = vpop.eup %1035 }
 0x200   : > { %688 = vst [vmem:[%s1238_s30 + $0x60] sm:$0xff] %v1036_v15 }
 0x201   : > { %v1038_v16 = vpop.eup %1037 }
 0x202   : > { %691 = vst [vmem:[%s1238_s30 + $0x78] sm:$0xff] %v1038_v16 }
 0x203   : > { %v1040_v17 = vpop.eup %1039 }
 0x204   : > { %690 = vst [vmem:[%s1238_s30 + $0x70] sm:$0xff] %v1040_v17 }
 0x205 PF: > { %s15_s18 = sadd.s32 1, %s1047_s18  }
 0x206   : > { %p12_p4 = scmp.ge.s32.totalorder %s15_s18, 4  }
 0x208   :  { %14 = sbr.rel (!%p12_p4) target bundleno = 1 (0x1), region = 70 }

</bundles_post_ra>
